<compile_context>
chip_gen: v5e
topology: v5e:2x2
jax: 0.10.0
libtpu: 0.0.40
codegen_flags: <defaults>
</compile_context>

<pallas_src>
import math
import functools

import jax
import jax.numpy as jnp
from jax import lax
from jax.experimental import pallas as pl
from jax.experimental.pallas import tpu as pltpu


# ----------------------------------------------------------------------------
# Pallas kernel: one block of BB batch elements (M = BB*T rows) per grid step
# ----------------------------------------------------------------------------
def encoder_kernel(M, T, E, C, K, dilation, out_lanes,
                   tok_ref,                      # (M, 1) int32  VMEM
                   emb_ref,                      # (V, E) bf16
                   w_pre_ref, b_pre_ref,         # (E, C) bf16, (1, C) f32
                   wg1_ref, bg1_ref,             # (K*C, 2C) bf16, (1, 2C) f32
                   wg2_ref, bg2_ref,             # (K*C, 2C) bf16, (1, 2C) f32
                   w_out_ref, b_out_ref,         # (C, out_lanes) bf16, (1, out_lanes) f32
                   e_place_ref,                  # (E, out_lanes) bf16
                   out_ref,                      # (M, out_lanes) f32
                   xpad_ref):                    # (M + 2*pad, C) f32 scratch
    pad = (K - 1) // 2 * dilation
    V = emb_ref.shape[0]
    sqrt_half = math.sqrt(0.5)

    # ---- embedding: vectorized one-hot matmul on the MXU (no per-token loop) ----
    tok = tok_ref[...]                                             # (M, 1) int32
    one_hot = (tok == lax.broadcasted_iota(jnp.int32, (M, V), 1)).astype(jnp.bfloat16)
    x_emb = jnp.dot(one_hot, emb_ref[...],
                    preferred_element_type=jnp.float32)            # (M, E) f32
    # F.dropout is identity in eval mode.
    # TODO(synk): training-mode dropout / padding_idx zero-row / n_speakers>1 speaker path.

    # ---- conv1d(E -> C, k=1) + ReLU ----
    x = jnp.maximum(
        jnp.dot(x_emb.astype(jnp.bfloat16), w_pre_ref[...],
                preferred_element_type=jnp.float32) + b_pre_ref[...], 0.0)   # (M, C) f32

    # Per-tap validity masks: row r of the folded (BB*T) block is time t = r % T of
    # its batch element; tap shift s is valid iff 0 <= t+s < T.  The masks zero both
    # out-of-sequence taps and cross-batch bleed inside the folded block.
    t_in_seq = lax.broadcasted_iota(jnp.int32, (M, 1), 0) % T
    masks = []
    for j in range(K):
        s = j * dilation - pad
        if s == 0:
            masks.append(None)
        else:
            ts = t_in_seq + s
            masks.append((ts >= 0) & (ts < T))

    # Zero only the 2*pad halo rows (never the whole buffer).
    if pad > 0:
        xpad_ref[pl.ds(0, pad), :] = jnp.zeros((pad, C), xpad_ref.dtype)
        xpad_ref[pl.ds(pad + M, pad), :] = jnp.zeros((pad, C), xpad_ref.dtype)

    def glu_block(x, w_ref, b_ref):
        residual = x
        xpad_ref[pl.ds(pad, M), :] = x                 # f32 scratch: sublane-clean shifts
        # K accumulating (M, C) @ (C, 2C) MXU matmuls -- no lane-unaligned concat.
        acc = None
        for j in range(K):
            s = j * dilation - pad
            tap = xpad_ref[pl.ds(pad + s, M), :]       # (M, C) f32
            if masks[j] is not None:
                tap = jnp.where(masks[j], tap, 0.0)
            d = jnp.dot(tap.astype(jnp.bfloat16), w_ref[pl.ds(j * C, C), :],
                        preferred_element_type=jnp.float32)        # (M, 2C) f32
            acc = d if acc is None else acc + d
        y = acc + b_ref[...]
        a = y[:, :C]
        g = y[:, C:]
        return (a * jax.nn.sigmoid(g) + residual) * sqrt_half

    x = glu_block(x, wg1_ref, bg1_ref)
    x = glu_block(x, wg2_ref, bg2_ref)

    # ---- final conv1d(C -> E) fused with keys/values assembly, all on the MXU:
    #   lanes [0:E)   = keys   = x @ w_post + b_post
    #   lanes [E:2E)  = values = sqrt(0.5) * (keys + embedding)
    #   other lanes   = 0
    # -> single unmasked lane-dense (M, out_lanes) store, no concatenate.
    out_ref[...] = (jnp.dot(x.astype(jnp.bfloat16), w_out_ref[...],
                            preferred_element_type=jnp.float32)
                    + b_out_ref[...]
                    + jnp.dot(x_emb.astype(jnp.bfloat16), e_place_ref[...],
                              preferred_element_type=jnp.float32))


# ----------------------------------------------------------------------------
# Host-side wrapper
# ----------------------------------------------------------------------------
def encoder_forward(tokens, params, dilation=1):
    B, T = tokens.shape
    V, E = params["emb"].shape
    K, C, C2 = params["wg1"].shape                     # (K, C, 2C)
    pad = (K - 1) // 2 * dilation
    out_lanes = max(128, pl.cdiv(2 * E, 128) * 128)

    # Batch blocking: fold BB batch elements into one (BB*T)-row MXU tile per grid
    # step (targets ~256 rows); keep >= 2 grid steps when B >= 2 so both v7x TCs work.
    ROWS_TARGET = 256
    min_steps = 2 if B >= 2 else 1
    bb_cap = max(1, ROWS_TARGET // T)
    bb_max = max(1, min(bb_cap, B // min_steps))
    BB = max(d for d in range(1, bb_max + 1) if B % d == 0)
    G = B // BB
    M = BB * T
    assert M % 8 == 0, "BB*T must be a multiple of 8 (sublane tiling)"

    sqrt_half = math.sqrt(0.5)

    # --- layout plumbing (host side): bf16 matmul operands; fused output weights ---
    emb = params["emb"].astype(jnp.bfloat16)
    w_pre = params["w_pre"].astype(jnp.bfloat16)
    b_pre = params["b_pre"].astype(jnp.float32)
    wg1 = params["wg1"].reshape(K * C, C2).astype(jnp.bfloat16)
    bg1 = params["bg1"].astype(jnp.float32)
    wg2 = params["wg2"].reshape(K * C, C2).astype(jnp.bfloat16)
    bg2 = params["bg2"].astype(jnp.float32)
    w_post = params["w_post"].astype(jnp.float32)      # (C, E)
    b_post = params["b_post"].astype(jnp.float32)      # (1, E)

    # Widened final projection: columns [W | sqrt(.5) W | 0], bias likewise.
    w_out = jnp.zeros((C, out_lanes), jnp.float32)
    w_out = w_out.at[:, :E].set(w_post).at[:, E:2 * E].set(sqrt_half * w_post)
    b_out = jnp.zeros((1, out_lanes), jnp.float32)
    b_out = b_out.at[:, :E].set(b_post).at[:, E:2 * E].set(sqrt_half * b_post)
    # Embedding placement: puts sqrt(.5)*embedding into the "values" lane slot.
    e_place = jnp.zeros((E, out_lanes), jnp.float32)
    e_place = e_place.at[:, E:2 * E].set(sqrt_half * jnp.eye(E, dtype=jnp.float32))
    w_out = w_out.astype(jnp.bfloat16)
    e_place = e_place.astype(jnp.bfloat16)

    tok_flat = tokens.reshape(B * T, 1).astype(jnp.int32)

    kernel = functools.partial(encoder_kernel, M, T, E, C, K, dilation, out_lanes)

    def const_spec(shape):
        zeros = (0,) * len(shape)
        return pl.BlockSpec(shape, lambda i: zeros)

    # NOTE: the constant-index weight specs are only fetched once by the pipeline
    # (block index never changes across the grid); single-buffering them explicitly
    # would only trim a negligible amount of VMEM at C=48.
    grid_spec = pltpu.PrefetchScalarGridSpec(
        num_scalar_prefetch=0,
        grid=(G,),
        in_specs=[
            pl.BlockSpec((M, 1), lambda i: (i, 0)),            # tokens
            const_spec(emb.shape),
            const_spec(w_pre.shape), const_spec(b_pre.shape),
            const_spec(wg1.shape), const_spec(bg1.shape),
            const_spec(wg2.shape), const_spec(bg2.shape),
            const_spec(w_out.shape), const_spec(b_out.shape),
            const_spec(e_place.shape),
        ],
        out_specs=pl.BlockSpec((M, out_lanes), lambda i: (i, 0)),
        scratch_shapes=[pltpu.VMEM((M + 2 * pad, C), jnp.float32)],
    )

    flops = 2 * B * T * (V * E + E * C + 2 * K * C * C2 + C * out_lanes + E * out_lanes)
    transcendentals = 2 * B * T * C                    # sigmoids in the GLU blocks
    bytes_accessed = (4 * B * T
                      + 2 * (emb.size + w_pre.size + wg1.size + wg2.size
                             + w_out.size + e_place.size)
                      + 4 * (b_pre.size + bg1.size + bg2.size + b_out.size)
                      + 4 * B * T * out_lanes)

    out = pl.pallas_call(
        kernel,
        out_shape=jax.ShapeDtypeStruct((B * T, out_lanes), jnp.float32),
        grid_spec=grid_spec,
        compiler_params=pltpu.CompilerParams(
            dimension_semantics=("parallel",)),
        cost_estimate=pl.CostEstimate(flops=flops,
                                      transcendentals=transcendentals,
                                      bytes_accessed=bytes_accessed),
    )(tok_flat, emb, w_pre, b_pre, wg1, bg1, wg2, bg2, w_out, b_out, e_place)

    keys = out[:, :E].reshape(B, T, E)
    values = out[:, E:2 * E].reshape(B, T, E)
    return keys, values


# ----------------------------------------------------------------------------
# Pure-JAX f32 reference (for correctness check)
# ----------------------------------------------------------------------------
def encoder_reference(tokens, params, dilation=1):
    emb = params["emb"]
    x = emb[tokens]                                        # (B, T, E)
    input_embedding = x
    x = jnp.maximum(jnp.einsum("bte,ec->btc", x, params["w_pre"])
                    + params["b_pre"], 0.0)
    K = params["wg1"].shape[0]
    pad = (K - 1) // 2 * dilation

    def glu(x, w, b):
        res = x
        _, T_, C_ = x.shape
        xp = jnp.pad(x, ((0, 0), (pad, pad), (0, 0)))
        y = sum(jnp.einsum("btc,cd->btd", xp[:, j * dilation:j * dilation + T_, :],
                           w[j]) for j in range(K)) + b
        a, g = y[..., :C_], y[..., C_:]
        return (a * jax.nn.sigmoid(g) + res) * math.sqrt(0.5)

    x = glu(x, params["wg1"], params["bg1"])
    x = glu(x, params["wg2"], params["bg2"])
    keys = jnp.einsum("btc,ce->bte", x, params["w_post"]) + params["b_post"]
    values = (keys + input_embedding) * math.sqrt(0.5)
    return keys, values


def init_params(key, n_vocab=32, embed_dim=32, conv_channels=48,
                kernel_size=5, dropout=0.1, embedding_weight_std=0.1):
    ks = jax.random.split(key, 5)

    def normal(k, shape, std):
        return (std * jax.random.normal(k, shape, jnp.float32)).astype(jnp.float32)

    # embedding (padding_idx handling omitted; synthetic weights)
    emb = normal(ks[0], (n_vocab, embed_dim), embedding_weight_std)

    # conv1d(E->C, k=1), std_mul=1.0, dropout=0
    std_pre = math.sqrt(1.0 / (1 * embed_dim))
    w_pre = normal(ks[1], (embed_dim, conv_channels), std_pre)
    b_pre = jnp.zeros((1, conv_channels), jnp.float32)

    # Conv1dGLU #1: conv1d(C -> 2C, k), std_mul=2.0
    std_g1 = math.sqrt(2.0 * (1 - dropout) / (kernel_size * conv_channels))
    wg1 = normal(ks[2], (kernel_size, conv_channels, 2 * conv_channels), std_g1)
    bg1 = jnp.zeros((1, 2 * conv_channels), jnp.float32)

    # Conv1dGLU #2: conv1d(C -> 2C, k), std_mul=4.0
    std_g2 = math.sqrt(4.0 * (1 - dropout) / (kernel_size * conv_channels))
    wg2 = normal(ks[3], (kernel_size, conv_channels, 2 * conv_channels), std_g2)
    bg2 = jnp.zeros((1, 2 * conv_channels), jnp.float32)

    # final conv1d(C -> E, k=1), std_mul=4.0, dropout=dropout
    std_post = math.sqrt(4.0 * (1 - dropout) / (1 * conv_channels))
    w_post = normal(ks[4], (conv_channels, embed_dim), std_post)
    b_post = jnp.zeros((1, embed_dim), jnp.float32)

    return dict(emb=emb, w_pre=w_pre, b_pre=b_pre,
                wg1=wg1, bg1=bg1, wg2=wg2, bg2=bg2,
                w_post=w_post, b_post=b_post)


if __name__ == "__main__":
    key = jax.random.PRNGKey(0)
    k_par, k_tok = jax.random.split(key)

    n_vocab, embed_dim = 32, 32
    B, T = 2, 16

    params = init_params(k_par, n_vocab=n_vocab, embed_dim=embed_dim,
                         conv_channels=48, kernel_size=5, dropout=0.1)
    text_sequences = jax.random.randint(k_tok, (B, T), 0, n_vocab, dtype=jnp.int32)

    keys, values = encoder_forward(text_sequences, params, dilation=1)
    jax.block_until_ready((keys, values))

    assert keys.shape == (B, T, embed_dim) and values.shape == (B, T, embed_dim)
    assert jnp.all(jnp.isfinite(keys)) and jnp.all(jnp.isfinite(values))

    # correctness vs pure-JAX f32 reference (bf16 matmul operands -> loose tol)
    keys_ref, values_ref = encoder_reference(text_sequences, params, dilation=1)
    assert jnp.allclose(keys, keys_ref, atol=5e-2, rtol=5e-2)
    assert jnp.allclose(values, values_ref, atol=5e-2, rtol=5e-2)

    print("KERNEL_OK")
</pallas_src>

<mosaic_0001>
module attributes {stable_mosaic.version = 11 : i64} {
  func.func @encoder_kernel(%arg0: i32, %arg1: memref<16x1xi32, #tpu.memory_space<vmem>>, %arg2: memref<32x32xbf16, #tpu.memory_space<vmem>>, %arg3: memref<32x48xbf16, #tpu.memory_space<vmem>>, %arg4: memref<1x48xf32, #tpu.memory_space<vmem>>, %arg5: memref<240x96xbf16, #tpu.memory_space<vmem>>, %arg6: memref<1x96xf32, #tpu.memory_space<vmem>>, %arg7: memref<240x96xbf16, #tpu.memory_space<vmem>>, %arg8: memref<1x96xf32, #tpu.memory_space<vmem>>, %arg9: memref<48x128xbf16, #tpu.memory_space<vmem>>, %arg10: memref<1x128xf32, #tpu.memory_space<vmem>>, %arg11: memref<32x128xbf16, #tpu.memory_space<vmem>>, %arg12: memref<16x128xf32, #tpu.memory_space<vmem>>, %arg13: memref<20x48xf32, #tpu.memory_space<vmem>>) attributes {dimension_semantics = [#tpu.dimension_semantics<parallel>], iteration_bounds = array<i64: 2>, scalar_prefetch = 0 : i64, scratch_operands = 1 : i64, tpu.core_type = #tpu.core_type<tc>, window_params = [{transform_indices = @transform_0, window_bounds = array<i64: 16, 1>}, {pipeline_mode = #tpu.pipeline_mode<synchronous>, transform_indices = @transform_1, window_bounds = array<i64: 32, 32>}, {pipeline_mode = #tpu.pipeline_mode<synchronous>, transform_indices = @transform_2, window_bounds = array<i64: 32, 48>}, {pipeline_mode = #tpu.pipeline_mode<synchronous>, transform_indices = @transform_3, window_bounds = array<i64: 1, 48>}, {pipeline_mode = #tpu.pipeline_mode<synchronous>, transform_indices = @transform_4, window_bounds = array<i64: 240, 96>}, {pipeline_mode = #tpu.pipeline_mode<synchronous>, transform_indices = @transform_5, window_bounds = array<i64: 1, 96>}, {pipeline_mode = #tpu.pipeline_mode<synchronous>, transform_indices = @transform_6, window_bounds = array<i64: 240, 96>}, {pipeline_mode = #tpu.pipeline_mode<synchronous>, transform_indices = @transform_7, window_bounds = array<i64: 1, 96>}, {pipeline_mode = #tpu.pipeline_mode<synchronous>, transform_indices = @transform_8, window_bounds = array<i64: 48, 128>}, {pipeline_mode = #tpu.pipeline_mode<synchronous>, transform_indices = @transform_9, window_bounds = array<i64: 1, 128>}, {pipeline_mode = #tpu.pipeline_mode<synchronous>, transform_indices = @transform_10, window_bounds = array<i64: 32, 128>}, {transform_indices = @transform_11, window_bounds = array<i64: 16, 128>}]} {
    %c0 = arith.constant 0 : index
    %c0_0 = arith.constant 0 : index
    %0 = vector.load %arg1[%c0, %c0_0] : memref<16x1xi32, #tpu.memory_space<vmem>>, vector<16x1xi32>
    %1 = tpu.iota {dimensions = array<i32: 1>} : vector<16x32xi32>
    %2 = vector.broadcast %0 : vector<16x1xi32> to vector<16x32xi32>
    %3 = arith.cmpi eq, %2, %1 : vector<16x32xi32>
    %4 = arith.extui %3 : vector<16x32xi1> to vector<16x32xi32>
    %5 = arith.sitofp %4 : vector<16x32xi32> to vector<16x32xf32>
    %6 = arith.truncf %5 : vector<16x32xf32> to vector<16x32xbf16>
    %c0_1 = arith.constant 0 : index
    %c0_2 = arith.constant 0 : index
    %7 = vector.load %arg2[%c0_1, %c0_2] : memref<32x32xbf16, #tpu.memory_space<vmem>>, vector<32x32xbf16>
    %cst = arith.constant dense<0.000000e+00> : vector<16x32xf32>
    %8 = tpu.matmul %6, %7, %cst {dimension_numbers = #tpu.dot_dimension_numbers<[1], [0], [0], [1], [0, 0, 1, 1], [], []>} : vector<16x32xbf16>, vector<32x32xbf16>, vector<16x32xf32> -> vector<16x32xf32>
    %9 = arith.truncf %8 : vector<16x32xf32> to vector<16x32xbf16>
    %c0_3 = arith.constant 0 : index
    %c0_4 = arith.constant 0 : index
    %10 = vector.load %arg3[%c0_3, %c0_4] : memref<32x48xbf16, #tpu.memory_space<vmem>>, vector<32x48xbf16>
    %cst_5 = arith.constant dense<0.000000e+00> : vector<16x48xf32>
    %11 = tpu.matmul %9, %10, %cst_5 {dimension_numbers = #tpu.dot_dimension_numbers<[1], [0], [0], [1], [0, 0, 1, 1], [], []>} : vector<16x32xbf16>, vector<32x48xbf16>, vector<16x48xf32> -> vector<16x48xf32>
    %c0_6 = arith.constant 0 : index
    %c0_7 = arith.constant 0 : index
    %12 = vector.load %arg4[%c0_6, %c0_7] : memref<1x48xf32, #tpu.memory_space<vmem>>, vector<1x48xf32>
    %13 = vector.broadcast %12 : vector<1x48xf32> to vector<16x48xf32>
    %14 = arith.addf %11, %13 : vector<16x48xf32>
    %cst_8 = arith.constant 0.000000e+00 : f32
    %15 = vector.broadcast %cst_8 : f32 to vector<16x48xf32>
    %16 = arith.maximumf %14, %15 : vector<16x48xf32>
    %17 = tpu.iota {dimensions = array<i32: 0>} : vector<16x1xi32>
    %c16_i32 = arith.constant 16 : i32
    %c0_i32 = arith.constant 0 : i32
    %18 = arith.cmpi eq, %c16_i32, %c0_i32 : i32
    %c1_i32 = arith.constant 1 : i32
    %19 = arith.select %18, %c1_i32, %c16_i32 : i32
    %20 = vector.broadcast %19 : i32 to vector<16x1xi32>
    %21 = arith.remsi %17, %20 : vector<16x1xi32>
    %c0_i32_9 = arith.constant 0 : i32
    %22 = vector.broadcast %c0_i32_9 : i32 to vector<16x1xi32>
    %23 = arith.cmpi ne, %21, %22 : vector<16x1xi32>
    %c0_i32_10 = arith.constant 0 : i32
    %24 = vector.broadcast %c0_i32_10 : i32 to vector<16x1xi32>
    %25 = arith.cmpi slt, %21, %24 : vector<16x1xi32>
    %c0_i32_11 = arith.constant 0 : i32
    %26 = arith.cmpi slt, %19, %c0_i32_11 : i32
    %27 = vector.broadcast %26 : i1 to vector<16x1xi1>
    %28 = vector.broadcast %27 : vector<16x1xi1> to vector<16x1xi1>
    %29 = arith.xori %25, %28 : vector<16x1xi1>
    %30 = arith.andi %29, %23 : vector<16x1xi1>
    %31 = vector.broadcast %19 : i32 to vector<16x1xi32>
    %32 = arith.addi %21, %31 : vector<16x1xi32>
    %33 = arith.select %30, %32, %21 : vector<16x1xi1>, vector<16x1xi32>
    %c-2_i32 = arith.constant -2 : i32
    %34 = vector.broadcast %c-2_i32 : i32 to vector<16x1xi32>
    %35 = arith.addi %33, %34 : vector<16x1xi32>
    %c0_i32_12 = arith.constant 0 : i32
    %36 = vector.broadcast %c0_i32_12 : i32 to vector<16x1xi32>
    %37 = arith.cmpi sge, %35, %36 : vector<16x1xi32>
    %c16_i32_13 = arith.constant 16 : i32
    %38 = vector.broadcast %c16_i32_13 : i32 to vector<16x1xi32>
    %39 = arith.cmpi slt, %35, %38 : vector<16x1xi32>
    %40 = arith.andi %37, %39 : vector<16x1xi1>
    %c-1_i32 = arith.constant -1 : i32
    %41 = vector.broadcast %c-1_i32 : i32 to vector<16x1xi32>
    %42 = arith.addi %33, %41 : vector<16x1xi32>
    %c0_i32_14 = arith.constant 0 : i32
    %43 = vector.broadcast %c0_i32_14 : i32 to vector<16x1xi32>
    %44 = arith.cmpi sge, %42, %43 : vector<16x1xi32>
    %c16_i32_15 = arith.constant 16 : i32
    %45 = vector.broadcast %c16_i32_15 : i32 to vector<16x1xi32>
    %46 = arith.cmpi slt, %42, %45 : vector<16x1xi32>
    %47 = arith.andi %44, %46 : vector<16x1xi1>
    %c1_i32_16 = arith.constant 1 : i32
    %48 = vector.broadcast %c1_i32_16 : i32 to vector<16x1xi32>
    %49 = arith.addi %33, %48 : vector<16x1xi32>
    %c0_i32_17 = arith.constant 0 : i32
    %50 = vector.broadcast %c0_i32_17 : i32 to vector<16x1xi32>
    %51 = arith.cmpi sge, %49, %50 : vector<16x1xi32>
    %c16_i32_18 = arith.constant 16 : i32
    %52 = vector.broadcast %c16_i32_18 : i32 to vector<16x1xi32>
    %53 = arith.cmpi slt, %49, %52 : vector<16x1xi32>
    %54 = arith.andi %51, %53 : vector<16x1xi1>
    %c2_i32 = arith.constant 2 : i32
    %55 = vector.broadcast %c2_i32 : i32 to vector<16x1xi32>
    %56 = arith.addi %33, %55 : vector<16x1xi32>
    %c0_i32_19 = arith.constant 0 : i32
    %57 = vector.broadcast %c0_i32_19 : i32 to vector<16x1xi32>
    %58 = arith.cmpi sge, %56, %57 : vector<16x1xi32>
    %c16_i32_20 = arith.constant 16 : i32
    %59 = vector.broadcast %c16_i32_20 : i32 to vector<16x1xi32>
    %60 = arith.cmpi slt, %56, %59 : vector<16x1xi32>
    %61 = arith.andi %58, %60 : vector<16x1xi1>
    %cst_21 = arith.constant 0.000000e+00 : f32
    %62 = vector.broadcast %cst_21 : f32 to vector<2x48xf32>
    %c0_22 = arith.constant 0 : index
    %c0_23 = arith.constant 0 : index
    %63 = vector.load %arg13[%c0_22, %c0_23] : memref<20x48xf32, #tpu.memory_space<vmem>>, vector<2x48xf32>
    tpu.vector_store %arg13[%c0_22, %c0_23], %62 {strides = array<i32>} : memref<20x48xf32, #tpu.memory_space<vmem>>, vector<2x48xf32>,
    %cst_24 = arith.constant 0.000000e+00 : f32
    %64 = vector.broadcast %cst_24 : f32 to vector<2x48xf32>
    %c18 = arith.constant 18 : index
    %c0_25 = arith.constant 0 : index
    %65 = vector.load %arg13[%c18, %c0_25] : memref<20x48xf32, #tpu.memory_space<vmem>>, vector<2x48xf32>
    tpu.vector_store %arg13[%c18, %c0_25], %64 {strides = array<i32>} : memref<20x48xf32, #tpu.memory_space<vmem>>, vector<2x48xf32>,
    %c2 = arith.constant 2 : index
    %c0_26 = arith.constant 0 : index
    %66 = vector.load %arg13[%c2, %c0_26] : memref<20x48xf32, #tpu.memory_space<vmem>>, vector<16x48xf32>
    tpu.vector_store %arg13[%c2, %c0_26], %16 {strides = array<i32>} : memref<20x48xf32, #tpu.memory_space<vmem>>, vector<16x48xf32>,
    %c0_27 = arith.constant 0 : index
    %c0_28 = arith.constant 0 : index
    %67 = vector.load %arg13[%c0_27, %c0_28] : memref<20x48xf32, #tpu.memory_space<vmem>>, vector<16x48xf32>
    %cst_29 = arith.constant 0.000000e+00 : f32
    %68 = vector.shape_cast %40 : vector<16x1xi1> to vector<16x1xi1>
    %69 = vector.broadcast %68 : vector<16x1xi1> to vector<16x48xi1>
    %70 = vector.broadcast %cst_29 : f32 to vector<16x48xf32>
    %71 = arith.select %69, %67, %70 : vector<16x48xi1>, vector<16x48xf32>
    %72 = arith.truncf %71 : vector<16x48xf32> to vector<16x48xbf16>
    %c0_30 = arith.constant 0 : index
    %c0_31 = arith.constant 0 : index
    %73 = vector.load %arg5[%c0_30, %c0_31] : memref<240x96xbf16, #tpu.memory_space<vmem>>, vector<48x96xbf16>
    %cst_32 = arith.constant dense<0.000000e+00> : vector<16x96xf32>
    %74 = tpu.matmul %72, %73, %cst_32 {dimension_numbers = #tpu.dot_dimension_numbers<[1], [0], [0], [1], [0, 0, 1, 1], [], []>} : vector<16x48xbf16>, vector<48x96xbf16>, vector<16x96xf32> -> vector<16x96xf32>
    %c1 = arith.constant 1 : index
    %c0_33 = arith.constant 0 : index
    %75 = vector.load %arg13[%c1, %c0_33] : memref<20x48xf32, #tpu.memory_space<vmem>>, vector<16x48xf32>
    %cst_34 = arith.constant 0.000000e+00 : f32
    %76 = vector.shape_cast %47 : vector<16x1xi1> to vector<16x1xi1>
    %77 = vector.broadcast %76 : vector<16x1xi1> to vector<16x48xi1>
    %78 = vector.broadcast %cst_34 : f32 to vector<16x48xf32>
    %79 = arith.select %77, %75, %78 : vector<16x48xi1>, vector<16x48xf32>
    %80 = arith.truncf %79 : vector<16x48xf32> to vector<16x48xbf16>
    %c48 = arith.constant 48 : index
    %c0_35 = arith.constant 0 : index
    %81 = vector.load %arg5[%c48, %c0_35] : memref<240x96xbf16, #tpu.memory_space<vmem>>, vector<48x96xbf16>
    %cst_36 = arith.constant dense<0.000000e+00> : vector<16x96xf32>
    %82 = tpu.matmul %80, %81, %cst_36 {dimension_numbers = #tpu.dot_dimension_numbers<[1], [0], [0], [1], [0, 0, 1, 1], [], []>} : vector<16x48xbf16>, vector<48x96xbf16>, vector<16x96xf32> -> vector<16x96xf32>
    %83 = arith.addf %74, %82 : vector<16x96xf32>
    %c2_37 = arith.constant 2 : index
    %c0_38 = arith.constant 0 : index
    %84 = vector.load %arg13[%c2_37, %c0_38] : memref<20x48xf32, #tpu.memory_space<vmem>>, vector<16x48xf32>
    %85 = arith.truncf %84 : vector<16x48xf32> to vector<16x48xbf16>
    %c96 = arith.constant 96 : index
    %c0_39 = arith.constant 0 : index
    %86 = vector.load %arg5[%c96, %c0_39] : memref<240x96xbf16, #tpu.memory_space<vmem>>, vector<48x96xbf16>
    %cst_40 = arith.constant dense<0.000000e+00> : vector<16x96xf32>
    %87 = tpu.matmul %85, %86, %cst_40 {dimension_numbers = #tpu.dot_dimension_numbers<[1], [0], [0], [1], [0, 0, 1, 1], [], []>} : vector<16x48xbf16>, vector<48x96xbf16>, vector<16x96xf32> -> vector<16x96xf32>
    %88 = arith.addf %83, %87 : vector<16x96xf32>
    %c3 = arith.constant 3 : index
    %c0_41 = arith.constant 0 : index
    %89 = vector.load %arg13[%c3, %c0_41] : memref<20x48xf32, #tpu.memory_space<vmem>>, vector<16x48xf32>
    %cst_42 = arith.constant 0.000000e+00 : f32
    %90 = vector.shape_cast %54 : vector<16x1xi1> to vector<16x1xi1>
    %91 = vector.broadcast %90 : vector<16x1xi1> to vector<16x48xi1>
    %92 = vector.broadcast %cst_42 : f32 to vector<16x48xf32>
    %93 = arith.select %91, %89, %92 : vector<16x48xi1>, vector<16x48xf32>
    %94 = arith.truncf %93 : vector<16x48xf32> to vector<16x48xbf16>
    %c144 = arith.constant 144 : index
    %c0_43 = arith.constant 0 : index
    %95 = vector.load %arg5[%c144, %c0_43] : memref<240x96xbf16, #tpu.memory_space<vmem>>, vector<48x96xbf16>
    %cst_44 = arith.constant dense<0.000000e+00> : vector<16x96xf32>
    %96 = tpu.matmul %94, %95, %cst_44 {dimension_numbers = #tpu.dot_dimension_numbers<[1], [0], [0], [1], [0, 0, 1, 1], [], []>} : vector<16x48xbf16>, vector<48x96xbf16>, vector<16x96xf32> -> vector<16x96xf32>
    %97 = arith.addf %88, %96 : vector<16x96xf32>
    %c4 = arith.constant 4 : index
    %c0_45 = arith.constant 0 : index
    %98 = vector.load %arg13[%c4, %c0_45] : memref<20x48xf32, #tpu.memory_space<vmem>>, vector<16x48xf32>
    %cst_46 = arith.constant 0.000000e+00 : f32
    %99 = vector.shape_cast %61 : vector<16x1xi1> to vector<16x1xi1>
    %100 = vector.broadcast %99 : vector<16x1xi1> to vector<16x48xi1>
    %101 = vector.broadcast %cst_46 : f32 to vector<16x48xf32>
    %102 = arith.select %100, %98, %101 : vector<16x48xi1>, vector<16x48xf32>
    %103 = arith.truncf %102 : vector<16x48xf32> to vector<16x48xbf16>
    %c192 = arith.constant 192 : index
    %c0_47 = arith.constant 0 : index
    %104 = vector.load %arg5[%c192, %c0_47] : memref<240x96xbf16, #tpu.memory_space<vmem>>, vector<48x96xbf16>
    %cst_48 = arith.constant dense<0.000000e+00> : vector<16x96xf32>
    %105 = tpu.matmul %103, %104, %cst_48 {dimension_numbers = #tpu.dot_dimension_numbers<[1], [0], [0], [1], [0, 0, 1, 1], [], []>} : vector<16x48xbf16>, vector<48x96xbf16>, vector<16x96xf32> -> vector<16x96xf32>
    %106 = arith.addf %97, %105 : vector<16x96xf32>
    %c0_49 = arith.constant 0 : index
    %c0_50 = arith.constant 0 : index
    %107 = vector.load %arg6[%c0_49, %c0_50] : memref<1x96xf32, #tpu.memory_space<vmem>>, vector<1x96xf32>
    %108 = vector.broadcast %107 : vector<1x96xf32> to vector<16x96xf32>
    %109 = arith.addf %106, %108 : vector<16x96xf32>
    %110 = vector.extract_strided_slice %109 {offsets = [0, 0], sizes = [16, 48], strides = [1, 1]} : vector<16x96xf32> to vector<16x48xf32>
    %111 = vector.extract_strided_slice %109 {offsets = [0, 48], sizes = [16, 48], strides = [1, 1]} : vector<16x96xf32> to vector<16x48xf32>
    %112 = arith.negf %111 : vector<16x48xf32>
    %113 = math.exp %112 : vector<16x48xf32>
    %cst_51 = arith.constant 1.000000e+00 : f32
    %114 = vector.broadcast %cst_51 : f32 to vector<16x48xf32>
    %115 = arith.addf %114, %113 : vector<16x48xf32>
    %116 = arith.divf %114, %115 : vector<16x48xf32>
    %117 = arith.mulf %110, %116 : vector<16x48xf32>
    %118 = arith.addf %117, %16 : vector<16x48xf32>
    %cst_52 = arith.constant 0.707106769 : f32
    %119 = vector.broadcast %cst_52 : f32 to vector<16x48xf32>
    %120 = arith.mulf %118, %119 : vector<16x48xf32>
    %c2_53 = arith.constant 2 : index
    %c0_54 = arith.constant 0 : index
    %121 = vector.load %arg13[%c2_53, %c0_54] : memref<20x48xf32, #tpu.memory_space<vmem>>, vector<16x48xf32>
    tpu.vector_store %arg13[%c2_53, %c0_54], %120 {strides = array<i32>} : memref<20x48xf32, #tpu.memory_space<vmem>>, vector<16x48xf32>,
    %c0_55 = arith.constant 0 : index
    %c0_56 = arith.constant 0 : index
    %122 = vector.load %arg13[%c0_55, %c0_56] : memref<20x48xf32, #tpu.memory_space<vmem>>, vector<16x48xf32>
    %cst_57 = arith.constant 0.000000e+00 : f32
    %123 = vector.shape_cast %40 : vector<16x1xi1> to vector<16x1xi1>
    %124 = vector.broadcast %123 : vector<16x1xi1> to vector<16x48xi1>
    %125 = vector.broadcast %cst_57 : f32 to vector<16x48xf32>
    %126 = arith.select %124, %122, %125 : vector<16x48xi1>, vector<16x48xf32>
    %127 = arith.truncf %126 : vector<16x48xf32> to vector<16x48xbf16>
    %c0_58 = arith.constant 0 : index
    %c0_59 = arith.constant 0 : index
    %128 = vector.load %arg7[%c0_58, %c0_59] : memref<240x96xbf16, #tpu.memory_space<vmem>>, vector<48x96xbf16>
    %cst_60 = arith.constant dense<0.000000e+00> : vector<16x96xf32>
    %129 = tpu.matmul %127, %128, %cst_60 {dimension_numbers = #tpu.dot_dimension_numbers<[1], [0], [0], [1], [0, 0, 1, 1], [], []>} : vector<16x48xbf16>, vector<48x96xbf16>, vector<16x96xf32> -> vector<16x96xf32>
    %c1_61 = arith.constant 1 : index
    %c0_62 = arith.constant 0 : index
    %130 = vector.load %arg13[%c1_61, %c0_62] : memref<20x48xf32, #tpu.memory_space<vmem>>, vector<16x48xf32>
    %cst_63 = arith.constant 0.000000e+00 : f32
    %131 = vector.shape_cast %47 : vector<16x1xi1> to vector<16x1xi1>
    %132 = vector.broadcast %131 : vector<16x1xi1> to vector<16x48xi1>
    %133 = vector.broadcast %cst_63 : f32 to vector<16x48xf32>
    %134 = arith.select %132, %130, %133 : vector<16x48xi1>, vector<16x48xf32>
    %135 = arith.truncf %134 : vector<16x48xf32> to vector<16x48xbf16>
    %c48_64 = arith.constant 48 : index
    %c0_65 = arith.constant 0 : index
    %136 = vector.load %arg7[%c48_64, %c0_65] : memref<240x96xbf16, #tpu.memory_space<vmem>>, vector<48x96xbf16>
    %cst_66 = arith.constant dense<0.000000e+00> : vector<16x96xf32>
    %137 = tpu.matmul %135, %136, %cst_66 {dimension_numbers = #tpu.dot_dimension_numbers<[1], [0], [0], [1], [0, 0, 1, 1], [], []>} : vector<16x48xbf16>, vector<48x96xbf16>, vector<16x96xf32> -> vector<16x96xf32>
    %138 = arith.addf %129, %137 : vector<16x96xf32>
    %c2_67 = arith.constant 2 : index
    %c0_68 = arith.constant 0 : index
    %139 = vector.load %arg13[%c2_67, %c0_68] : memref<20x48xf32, #tpu.memory_space<vmem>>, vector<16x48xf32>
    %140 = arith.truncf %139 : vector<16x48xf32> to vector<16x48xbf16>
    %c96_69 = arith.constant 96 : index
    %c0_70 = arith.constant 0 : index
    %141 = vector.load %arg7[%c96_69, %c0_70] : memref<240x96xbf16, #tpu.memory_space<vmem>>, vector<48x96xbf16>
    %cst_71 = arith.constant dense<0.000000e+00> : vector<16x96xf32>
    %142 = tpu.matmul %140, %141, %cst_71 {dimension_numbers = #tpu.dot_dimension_numbers<[1], [0], [0], [1], [0, 0, 1, 1], [], []>} : vector<16x48xbf16>, vector<48x96xbf16>, vector<16x96xf32> -> vector<16x96xf32>
    %143 = arith.addf %138, %142 : vector<16x96xf32>
    %c3_72 = arith.constant 3 : index
    %c0_73 = arith.constant 0 : index
    %144 = vector.load %arg13[%c3_72, %c0_73] : memref<20x48xf32, #tpu.memory_space<vmem>>, vector<16x48xf32>
    %cst_74 = arith.constant 0.000000e+00 : f32
    %145 = vector.shape_cast %54 : vector<16x1xi1> to vector<16x1xi1>
    %146 = vector.broadcast %145 : vector<16x1xi1> to vector<16x48xi1>
    %147 = vector.broadcast %cst_74 : f32 to vector<16x48xf32>
    %148 = arith.select %146, %144, %147 : vector<16x48xi1>, vector<16x48xf32>
    %149 = arith.truncf %148 : vector<16x48xf32> to vector<16x48xbf16>
    %c144_75 = arith.constant 144 : index
    %c0_76 = arith.constant 0 : index
    %150 = vector.load %arg7[%c144_75, %c0_76] : memref<240x96xbf16, #tpu.memory_space<vmem>>, vector<48x96xbf16>
    %cst_77 = arith.constant dense<0.000000e+00> : vector<16x96xf32>
    %151 = tpu.matmul %149, %150, %cst_77 {dimension_numbers = #tpu.dot_dimension_numbers<[1], [0], [0], [1], [0, 0, 1, 1], [], []>} : vector<16x48xbf16>, vector<48x96xbf16>, vector<16x96xf32> -> vector<16x96xf32>
    %152 = arith.addf %143, %151 : vector<16x96xf32>
    %c4_78 = arith.constant 4 : index
    %c0_79 = arith.constant 0 : index
    %153 = vector.load %arg13[%c4_78, %c0_79] : memref<20x48xf32, #tpu.memory_space<vmem>>, vector<16x48xf32>
    %cst_80 = arith.constant 0.000000e+00 : f32
    %154 = vector.shape_cast %61 : vector<16x1xi1> to vector<16x1xi1>
    %155 = vector.broadcast %154 : vector<16x1xi1> to vector<16x48xi1>
    %156 = vector.broadcast %cst_80 : f32 to vector<16x48xf32>
    %157 = arith.select %155, %153, %156 : vector<16x48xi1>, vector<16x48xf32>
    %158 = arith.truncf %157 : vector<16x48xf32> to vector<16x48xbf16>
    %c192_81 = arith.constant 192 : index
    %c0_82 = arith.constant 0 : index
    %159 = vector.load %arg7[%c192_81, %c0_82] : memref<240x96xbf16, #tpu.memory_space<vmem>>, vector<48x96xbf16>
    %cst_83 = arith.constant dense<0.000000e+00> : vector<16x96xf32>
    %160 = tpu.matmul %158, %159, %cst_83 {dimension_numbers = #tpu.dot_dimension_numbers<[1], [0], [0], [1], [0, 0, 1, 1], [], []>} : vector<16x48xbf16>, vector<48x96xbf16>, vector<16x96xf32> -> vector<16x96xf32>
    %161 = arith.addf %152, %160 : vector<16x96xf32>
    %c0_84 = arith.constant 0 : index
    %c0_85 = arith.constant 0 : index
    %162 = vector.load %arg8[%c0_84, %c0_85] : memref<1x96xf32, #tpu.memory_space<vmem>>, vector<1x96xf32>
    %163 = vector.broadcast %162 : vector<1x96xf32> to vector<16x96xf32>
    %164 = arith.addf %161, %163 : vector<16x96xf32>
    %165 = vector.extract_strided_slice %164 {offsets = [0, 0], sizes = [16, 48], strides = [1, 1]} : vector<16x96xf32> to vector<16x48xf32>
    %166 = vector.extract_strided_slice %164 {offsets = [0, 48], sizes = [16, 48], strides = [1, 1]} : vector<16x96xf32> to vector<16x48xf32>
    %167 = arith.negf %166 : vector<16x48xf32>
    %168 = math.exp %167 : vector<16x48xf32>
    %cst_86 = arith.constant 1.000000e+00 : f32
    %169 = vector.broadcast %cst_86 : f32 to vector<16x48xf32>
    %170 = arith.addf %169, %168 : vector<16x48xf32>
    %171 = arith.divf %169, %170 : vector<16x48xf32>
    %172 = arith.mulf %165, %171 : vector<16x48xf32>
    %173 = arith.addf %172, %120 : vector<16x48xf32>
    %cst_87 = arith.constant 0.707106769 : f32
    %174 = vector.broadcast %cst_87 : f32 to vector<16x48xf32>
    %175 = arith.mulf %173, %174 : vector<16x48xf32>
    %176 = arith.truncf %175 : vector<16x48xf32> to vector<16x48xbf16>
    %c0_88 = arith.constant 0 : index
    %c0_89 = arith.constant 0 : index
    %177 = vector.load %arg9[%c0_88, %c0_89] : memref<48x128xbf16, #tpu.memory_space<vmem>>, vector<48x128xbf16>
    %cst_90 = arith.constant dense<0.000000e+00> : vector<16x128xf32>
    %178 = tpu.matmul %176, %177, %cst_90 {dimension_numbers = #tpu.dot_dimension_numbers<[1], [0], [0], [1], [0, 0, 1, 1], [], []>} : vector<16x48xbf16>, vector<48x128xbf16>, vector<16x128xf32> -> vector<16x128xf32>
    %c0_91 = arith.constant 0 : index
    %c0_92 = arith.constant 0 : index
    %179 = vector.load %arg10[%c0_91, %c0_92] : memref<1x128xf32, #tpu.memory_space<vmem>>, vector<1x128xf32>
    %180 = vector.broadcast %179 : vector<1x128xf32> to vector<16x128xf32>
    %181 = arith.addf %178, %180 : vector<16x128xf32>
    %182 = arith.truncf %8 : vector<16x32xf32> to vector<16x32xbf16>
    %c0_93 = arith.constant 0 : index
    %c0_94 = arith.constant 0 : index
    %183 = vector.load %arg11[%c0_93, %c0_94] : memref<32x128xbf16, #tpu.memory_space<vmem>>, vector<32x128xbf16>
    %cst_95 = arith.constant dense<0.000000e+00> : vector<16x128xf32>
    %184 = tpu.matmul %182, %183, %cst_95 {dimension_numbers = #tpu.dot_dimension_numbers<[1], [0], [0], [1], [0, 0, 1, 1], [], []>} : vector<16x32xbf16>, vector<32x128xbf16>, vector<16x128xf32> -> vector<16x128xf32>
    %185 = arith.addf %181, %184 : vector<16x128xf32>
    %c0_96 = arith.constant 0 : index
    %c0_97 = arith.constant 0 : index
    %186 = vector.load %arg12[%c0_96, %c0_97] : memref<16x128xf32, #tpu.memory_space<vmem>>, vector<16x128xf32>
    tpu.vector_store %arg12[%c0_96, %c0_97], %185 {strides = array<i32>} : memref<16x128xf32, #tpu.memory_space<vmem>>, vector<16x128xf32>,
    return
  }
  func.func @transform_0(%arg0: i32) -> (i32, i32) {
    %c0_i32 = arith.constant 0 : i32
    %c0_i32_0 = arith.constant 0 : i32
    return %arg0, %c0_i32 : i32, i32
  }
  func.func @transform_1(%arg0: i32) -> (i32, i32) {
    %c0_i32 = arith.constant 0 : i32
    %c0_i32_0 = arith.constant 0 : i32
    %c0_i32_1 = arith.constant 0 : i32
    return %c0_i32, %c0_i32_0 : i32, i32
  }
  func.func @transform_2(%arg0: i32) -> (i32, i32) {
    %c0_i32 = arith.constant 0 : i32
    %c0_i32_0 = arith.constant 0 : i32
    %c0_i32_1 = arith.constant 0 : i32
    return %c0_i32, %c0_i32_0 : i32, i32
  }
  func.func @transform_3(%arg0: i32) -> (i32, i32) {
    %c0_i32 = arith.constant 0 : i32
    %c0_i32_0 = arith.constant 0 : i32
    %c0_i32_1 = arith.constant 0 : i32
    return %c0_i32, %c0_i32_0 : i32, i32
  }
  func.func @transform_4(%arg0: i32) -> (i32, i32) {
    %c0_i32 = arith.constant 0 : i32
    %c0_i32_0 = arith.constant 0 : i32
    %c0_i32_1 = arith.constant 0 : i32
    return %c0_i32, %c0_i32_0 : i32, i32
  }
  func.func @transform_5(%arg0: i32) -> (i32, i32) {
    %c0_i32 = arith.constant 0 : i32
    %c0_i32_0 = arith.constant 0 : i32
    %c0_i32_1 = arith.constant 0 : i32
    return %c0_i32, %c0_i32_0 : i32, i32
  }
  func.func @transform_6(%arg0: i32) -> (i32, i32) {
    %c0_i32 = arith.constant 0 : i32
    %c0_i32_0 = arith.constant 0 : i32
    %c0_i32_1 = arith.constant 0 : i32
    return %c0_i32, %c0_i32_0 : i32, i32
  }
  func.func @transform_7(%arg0: i32) -> (i32, i32) {
    %c0_i32 = arith.constant 0 : i32
    %c0_i32_0 = arith.constant 0 : i32
    %c0_i32_1 = arith.constant 0 : i32
    return %c0_i32, %c0_i32_0 : i32, i32
  }
  func.func @transform_8(%arg0: i32) -> (i32, i32) {
    %c0_i32 = arith.constant 0 : i32
    %c0_i32_0 = arith.constant 0 : i32
    %c0_i32_1 = arith.constant 0 : i32
    return %c0_i32, %c0_i32_0 : i32, i32
  }
  func.func @transform_9(%arg0: i32) -> (i32, i32) {
    %c0_i32 = arith.constant 0 : i32
    %c0_i32_0 = arith.constant 0 : i32
    %c0_i32_1 = arith.constant 0 : i32
    return %c0_i32, %c0_i32_0 : i32, i32
  }
  func.func @transform_10(%arg0: i32) -> (i32, i32) {
    %c0_i32 = arith.constant 0 : i32
    %c0_i32_0 = arith.constant 0 : i32
    %c0_i32_1 = arith.constant 0 : i32
    return %c0_i32, %c0_i32_0 : i32, i32
  }
  func.func @transform_11(%arg0: i32) -> (i32, i32) {
    %c0_i32 = arith.constant 0 : i32
    %c0_i32_0 = arith.constant 0 : i32
    return %arg0, %c0_i32 : i32, i32
  }
}

</mosaic_0001>

<bundles_post_ra>
// kernel: tpu_custom_call.1
= control target key start
LH: loop header
LB: loop body
LE: loop exit
PB: predicated region body
PF: predicated region fallthrough
CT: control target
= control target key end

     0   :  { %s2024_s0 = inlined_call_operand.vmem [shape: s32[32,1], index: 0, kind: input, shape index: {}]   ;;  %s2025_s1 = inlined_call_operand.vmem [shape: bf16[32,32], index: 1, kind: input, shape index: {}]   ;;  %s2026_s2 = inlined_call_operand.vmem [shape: bf16[32,48], index: 2, kind: input, shape index: {}]   ;;  %s2027_s3 = inlined_call_operand.vmem [shape: f32[1,48], index: 3, kind: input, shape index: {}]   ;;  %s2028_s4 = inlined_call_operand.vmem [shape: bf16[240,96], index: 4, kind: input, shape index: {}]   ;;  %s2029_s5 = inlined_call_operand.vmem [shape: f32[1,96], index: 5, kind: input, shape index: {}]   ;;  %s2030_s6 = inlined_call_operand.vmem [shape: bf16[240,96], index: 6, kind: input, shape index: {}]   ;;  %s2031_s7 = inlined_call_operand.vmem [shape: f32[1,96], index: 7, kind: input, shape index: {}]   ;;  %s2032_s8 = inlined_call_operand.vmem [shape: bf16[48,128], index: 8, kind: input, shape index: {}]   ;;  %s2033_s9 = inlined_call_operand.vmem [shape: f32[1,128], index: 9, kind: input, shape index: {}]   ;;  %s2034_s10 = inlined_call_operand.vmem [shape: bf16[32,128], index: 10, kind: input, shape index: {}]   ;;  %s2035_s11 = inlined_call_operand.hbm [shape: f32[32,128], index: 11, kind: output, shape index: {}]  }
   0x1   :  { %2038 = sst [smem:[#allocation6_spill]] %s2024_s0 }
   0x2   :  { %16 = vsyncpa [#allocation4], 0 }
   0x3   :  { %18 = vsyncpa [#allocation4 + $0x1], 0  ;;  %s1727_s17 = smov 0   ;;  %s1729_s18 = smov 0  }
   0x4   :  { %s1731_s19 = smov 0   ;;  %s1733_s20 = smov 0  }
   0x5 LB: > { %s1748_s21 = sadd.s32 4294967295, %s1660_s20   ;;  %s1305_s22 = sadd.s32 4294967294, %s1660_s20   ;;  %s1660_s20 = sphi %s1733_s20, %s2046_s20   ;;  %s1656_s19 = sphi %s1731_s19, %s2045_s19   ;;  %s1652_s18 = sphi %s1729_s18, %s2044_s18   ;;  %s1648_s17 = sphi %s1727_s17, %s2043_s17  }
   0x6   : > { %s1752_s23 = sadd.s32 1, %s1660_s20   ;;  %s267_s24 = sadd.s32 1, %s1656_s19 }
   0x7   : > { %s264_s25 = ssub.s32 %s1660_s20, %s1752_s23  ;;  %p277_p0 = scmp.ne.s32.totalorder %s1656_s19, %s1652_s18 }
   0x8   : > { %p265_p1 = scmp.eq.s32.totalorder %s264_s25, 0  ;;  %p278_p2 = scmp.eq.s32.totalorder %s1748_s21, 1 }
   0x9   : > { %p283_p3 = scmp.ne.s32.totalorder %s1652_s18, %s1648_s17  ;;  %p284_p4 = scmp.eq.s32.totalorder %s1305_s22, 1 }
   0xa   : > { %s1763_s26 = scalar_select %p265_p1, %s1656_s19, %s267_s24  }
   0xb   : > { %p1765_p5 = por %p278_p2, %p277_p0  ;;  %p1769_p6 = por %p284_p4, %p283_p3 }
   0xc   : > { %p1308_p7 = scmp.ge.s32.totalorder %s1660_s20, 1  ;;  %p341_p8 = scmp.lt.s32.totalorder %s1660_s20, 3 }
   0xe   : > { %p342_p9 = pnand %p1308_p7, %p341_p8 }
   0xf   : > { %s1310_s29 = sshll.u32 (!%p342_p9), %s1748_s21, 1  ;;  %s2041_s0 = sld [smem:[#allocation6_spill]] (!%p342_p9) }
  0x10   : > { %345 = sbr.rel (%p342_p9) target bundleno = 1184 (0x4a0), region = 64  ;;  %p382_p10 = scmp.lt.s32.totalorder (!%p342_p9), %s1310_s29, 3 }
  0x11   : > { %s2036_s22 = smov (!%p342_p9), 80   ;;  %s1532_s15 = sshll.u32 (!%p342_p9), %s1748_s21, 4 }
  0x12   : > { %s1239_s25 = scalar_lea.hbm (!%p342_p9), %s2035_s11, %s1532_s15  ;;  %s1618_s15 = scalar_lea.hbm (!%p342_p9), %s2035_s11, 32 }
  0x15   : > { %vm539_vm0 = vcmask 386048   ;;  %v1662_v0 = vmov 0   ;;  %v1663_v1 = vmov 0.0   ;;  %s2048_s29 = smov (!%p382_p10, %s1310_s29), 3  ;;  %v1494_v4 = vld [vmem:[%s2025_s1 + $0x8] sm:$0xff]  ;;  %v1493_v5 = vld [vmem:[%s2025_s1] sm:$0xff]  ;;  %v391_v6 = vlaneseq }
  0x16   : > { %1577 = vset.pattern.permute.xlu0 %v1662_v0  ;;  %540 = vst.msk [vmem:[#allocation2] sm:$0x3] %vm539_vm0, %v1663_v1  ;;  %s1311_s30 = sshll.u32 %s2048_s29, 3  ;;  %432 = vmatpush.bf16.msra.mxu0 %v1494_v4  ;;  %vm422_vm3 = vcmask 261120   ;;  %v1496_v13 = vld [vmem:[%s2026_s2 + $0x8] sm:$0xff]  ;;  %v1495_v14 = vld [vmem:[%s2026_s2] sm:$0xff] }
  0x17   : > { %541 = vst.msk [vmem:[#allocation2 + $0x12] sm:$0x3] %vm539_vm0, %v1663_v1  ;;  %s385_s14 = scalar_lea.vmem %s2041_s0, %s1311_s30  ;;  %v392_v8 = vand.u32 127, %v391_v6  ;;  %470 = vmatpush.bf16.msra.mxu1 %v1496_v13  ;;  %v1502_v18 = vld [vmem:[%s2028_s4 + $0x28] sm:$0xff]  ;;  %v1499_v19 = vld [vmem:[%s2028_s4 + $0x10] sm:$0xff]  ;;  %v1505_v20 = vld [vmem:[%s2028_s4 + $0x40] sm:$0xff] }
  0x18   : > { %v389_v2 = vld [vmem:[%s385_s14] sm:$0xff]  ;;  %v390_v3 = vld [vmem:[%s385_s14 + $0x8] sm:$0xff]  ;;  %v1508_v21 = vld [vmem:[%s2028_s4 + $0x58] sm:$0xff]  ;;  %601 = vmatpush.bf16.msra.mxu2 %v1502_v18  ;;  %636 = vmatpush.bf16.msra.mxu3 %v1499_v19  ;;  %vm542_vm4 = vcmask 392192   ;;  %v481_v37 = vshrl.u32 %v391_v6, 7  ;;  %s2042_s14 = smov 80  }
  0x19   : > { %394 = vperm.xlu0 %1577, %v389_v2   ;;  %v1501_v22 = vld [vmem:[%s2028_s4 + $0x20] sm:$0xff]  ;;  %v1498_v23 = vld [vmem:[%s2028_s4 + $0x8] sm:$0xff]  ;;  %v1504_v24 = vld [vmem:[%s2028_s4 + $0x38] sm:$0xff]  ;;  %s378_s30 = sand.u32 1, %s1652_s18   ;;  %s1242_s0 = sshll.u32 %s1239_s25, 4  ;;  %s1243_s0 = int_to_ptr.hbm [resolvable:$true] %s1242_s0 }
  0x1a   : > { %433 = vmatpush.bf16.msra.mxu0 %v1493_v5  ;;  %v1507_v25 = vld [vmem:[%s2028_s4 + $0x50] sm:$0xff]  ;;  %v1500_v26 = vld [vmem:[%s2028_s4 + $0x18] sm:$0xff]  ;;  %v1497_v27 = vld [vmem:[%s2028_s4] sm:$0xff]  ;;  %v482_v38 = vadd.s32 8, %v481_v37  ;;  %v487_v41 = vand.u32 15, %v481_v37  ;;  %s1228_s12 = scalar_lea.sflag [#allocation4], %s378_s30 }
  0x1b   : > { %471 = vmatpush.bf16.msra.mxu1 %v1495_v14  ;;  %v1503_v28 = vld [vmem:[%s2028_s4 + $0x30] sm:$0xff]  ;;  %v1506_v29 = vld [vmem:[%s2028_s4 + $0x48] sm:$0xff]  ;;  %v1578_v32 = vld [vmem:[%s2027_s3] ss:$0 sm:$0xff]  ;;  %s1612_s13 = sshra.s32 %s1243_s0, 4  ;;  %s1613_s13 = int_to_ptr.hbm [resolvable:$true] %s1612_s13 }
  0x1c   : > { %602 = vmatpush.bf16.msra.mxu2 %v1501_v22  ;;  %637 = vmatpush.bf16.msra.mxu3 %v1498_v23  ;;  %v1511_v30 = vld [vmem:[%s2028_s4 + $0x70] sm:$0xff]  ;;  %v1510_v31 = vld [vmem:[%s2028_s4 + $0x68] sm:$0xff]  ;;  %v1509_v33 = vld [vmem:[%s2028_s4 + $0x60] sm:$0xff]  ;;  %v494_v42 = vand.u32 15, %v482_v38  ;;  %v1856_v44 = vadd.s32 4294967295, %v487_v41  ;;  %v1858_v45 = vadd.s32 4294967294, %v487_v41  ;;  %p1619_p0 = scmp.lt.s32.totalorder %s1613_s13, %s2035_s11 }
  0x1d   : > { %v1579_v13 = vld [vmem:[%s2029_s5] ss:$0 sm:$0xff]  ;;  %s1614_s21 = scalar_lea.hbm %s1613_s13, 16 }
  0x1e   : > { %680 = vmatpush.bf16.msrb.mxu0 %v1505_v20  ;;  %v1860_v46 = vadd.s32 1, %v494_v42  ;;  %vm517_vm5 = vcmp.ge.s32.totalorder %v1856_v44, 0  ;;  %vm509_vm6 = vcmp.ge.s32.totalorder %v1858_v45, 0  ;;  %v1875_v62 = vadd.s32 2, %v494_v42  ;;  %p1615_p11 = scmp.ne.s32.totalorder %s1613_s13, %s1614_s21  ;;  %p1620_p1 = scmp.lt.s32.totalorder %s1618_s15, %s1614_s21 }
  0x1f   : > { %732 = vmatpush.bf16.msrb.mxu1 %v1508_v21 }
  0x20   : > { %603 = vmatpush.bf16.msra.mxu2 %v1500_v26  ;;  %638 = vmatpush.bf16.msra.mxu3 %v1497_v27  ;;  %vm528_vm7 = vcmp.lt.s32.totalorder %v1860_v46, 16  ;;  %vm536_vm8 = vcmp.lt.s32.totalorder %v1875_v62, 16  ;;  %v1580_v62 = vld [vmem:[%s2031_s7] ss:$0 sm:$0xff]  ;;  %p1616_p12 = pnand %p1615_p11, %p1765_p5  ;;  %p1621_p2 = por %p1620_p1, %p1619_p0 }
  0x21   : > { %397 = vperm.xlu0 %1577, %v390_v3  }
  0x22   : > { %681 = vmatpush.bf16.msrb.mxu0 %v1504_v24  ;;  %p1617_p13 = pneg %p1616_p12 }
  0x23   : > { %733 = vmatpush.bf16.msrb.mxu1 %v1507_v25 }
  0x24   : > { %784 = vmatpush.bf16.msrb.mxu2 %v1511_v30  ;;  %p1622_p3 = pnand %p1621_p2, %p1617_p13 }
  0x26   : > { %682 = vmatpush.bf16.msrb.mxu0 %v1503_v28 }
  0x27   : > { %734 = vmatpush.bf16.msrb.mxu1 %v1506_v29 }
  0x28   : > { %785 = vmatpush.bf16.msrb.mxu2 %v1510_v31 }
  0x2c   : > { %786 = vmatpush.bf16.msrb.mxu2 %v1509_v33 }
  0x8b   : > { %v395_v7 = vpop.permute.xlu0 %394 }
  0x8c   : > { %vm399_vm1 = vcmp.eq.s32.totalorder %v395_v7, %v392_v8 }
  0x8d   : > { %v1312_v10 = vsel %vm399_vm1, 1.0, %v1663_v1 }
  0x93   : > { %v398_v9 = vpop.permute.xlu0 %397 }
  0x94   : > { %vm400_vm2 = vcmp.eq.s32.totalorder %v398_v9, %v392_v8 }
  0x95   : > { %v1313_v11 = vsel %vm400_vm2, 1.0, %v1663_v1 }
  0x96   : > { %v405_v12 = vpack.c.bf16 %v1313_v11, %v1312_v10 }
  0x98   : > { %1322 = vmatmul.msk.bf16.vlgmr.msra.gmra.mxu0 %vm422_vm3, %v405_v12 }
 0x115   : > { %v435_v15 = vpop.f32.mrf.mxu0 }
 0x11d   : > { %v437_v16 = vpop.f32.mrf.mxu0 }
 0x11e   : > { %v1792_v17 = vpack.c.bf16 %v437_v16, %v435_v15 }
 0x120   : > { %1331 = vmatmul.msk.bf16.vlgmr.msra.gmra.mxu1 %vm422_vm3, %v1792_v17 }
 0x19d   : > { %v473_v34 = vpop.f32.mrf.mxu1 }
 0x19e   : > { %v1844_v35 = vadd.f32 %v1578_v32, %v473_v34 }
 0x1a0   : > { %v478_v36 = vmax.f32 %v1844_v35, 0.0 }
 0x1a2   : > { %543 = vst.msk [vmem:[#allocation2 + $0x2] sm:$0xff] %vm542_vm4, %v478_v36 }
 0x1a5   : > { %v475_v39 = vpop.f32.mrf.mxu1 }
 0x1a6   : > { %v1850_v40 = vadd.f32 %v1578_v32, %v475_v39 }
 0x1a8   : > { %v479_v43 = vmax.f32 %v1850_v40, 0.0 }
 0x1a9   : > { %v560_v47 = vld [vmem:[#allocation2 + $0x1] sm:$0xff] }
 0x1aa   : > { %544 = vst.msk [vmem:[#allocation2 + $0xa] sm:$0xff] %vm542_vm4, %v479_v43  ;;  %v545_v48 = vld [vmem:[#allocation2] sm:$0xff]  ;;  %v566_v51 = vsel %vm517_vm5, %v560_v47, 0.0 }
 0x1ab   : > { %v645_v49 = vld [vmem:[#allocation2 + $0x2] sm:$0xff]  ;;  %v551_v53 = vsel %vm509_vm6, %v545_v48, 0.0 }
 0x1b1   : > { %v561_v50 = vld [vmem:[#allocation2 + $0x9] sm:$0xff] }
 0x1b2   : > { %v546_v52 = vld [vmem:[#allocation2 + $0x8] sm:$0xff]  ;;  %v568_v55 = vpack.c.bf16 %v561_v50, %v566_v51 }
 0x1b3   : > { %v646_v54 = vld [vmem:[#allocation2 + $0xa] sm:$0xff]  ;;  %v553_v56 = vpack.c.bf16 %v546_v52, %v551_v53 }
 0x1b4   : > { %v647_v57 = vpack.c.bf16 %v646_v54, %v645_v49  ;;  %v691_v58 = vld [vmem:[#allocation2 + $0x3] sm:$0xff]  ;;  %v692_v59 = vld [vmem:[#allocation2 + $0xb] sm:$0xff]  ;;  %1344 = vmatmul.msk.bf16.vlgmr.msra.gmra.mxu2 %vm542_vm4, %v568_v55 }
 0x1b5   : > { %v698_v60 = vsel %vm528_vm7, %v692_v59, 0.0  ;;  %1357 = vmatmul.msk.bf16.vlgmr.msra.gmra.mxu3 %vm542_vm4, %v553_v56  ;;  %v744_v63 = vld [vmem:[#allocation2 + $0xc] sm:$0xff]  ;;  %v743_v0 = vld [vmem:[#allocation2 + $0x4] sm:$0xff] }
 0x1b6   : > { %v699_v61 = vpack.c.bf16 %v698_v60, %v691_v58  ;;  %1370 = vmatmul.msk.bf16.vlgmr.msrb.gmra.mxu0 %vm542_vm4, %v647_v57  ;;  %v750_v1 = vsel %vm536_vm8, %v744_v63, 0.0  ;;  %v1517_v58 = vld [vmem:[%s2030_s6 + $0x28] sm:$0xff]  ;;  %v1514_v59 = vld [vmem:[%s2030_s6 + $0x10] sm:$0xff]  ;;  %v1520_v60 = vld [vmem:[%s2030_s6 + $0x40] sm:$0xff] }
 0x1b7   : > { %v751_v2 = vpack.c.bf16 %v750_v1, %v743_v0  ;;  %903 = vmatpush.bf16.msrb.mxu3 %v1517_v58  ;;  %938 = vmatpush.bf16.msra.mxu0 %v1514_v59  ;;  %v1516_v63 = vld [vmem:[%s2030_s6 + $0x20] sm:$0xff]  ;;  %v1513_v0 = vld [vmem:[%s2030_s6 + $0x8] sm:$0xff]  ;;  %v1519_v1 = vld [vmem:[%s2030_s6 + $0x38] sm:$0xff] }
 0x1b8   : > { %1383 = vmatmul.msk.bf16.vlgmr.msrb.gmra.mxu1 %vm542_vm4, %v699_v61  ;;  %v1523_v61 = vld [vmem:[%s2030_s6 + $0x58] sm:$0xff] }
 0x1b9   : > { %982 = vmatpush.bf16.msra.mxu1 %v1520_v60  ;;  %1030 = vmatpush.bf16.msra.mxu2 %v1523_v61 }
 0x1bb   : > { %904 = vmatpush.bf16.msrb.mxu3 %v1516_v63  ;;  %939 = vmatpush.bf16.msra.mxu0 %v1513_v0 }
 0x1bd   : > { %983 = vmatpush.bf16.msra.mxu1 %v1519_v1 }
 0x1c4   : > { %1396 = vmatmul.msk.bf16.vlgmr.msrb.gmra.mxu2 %vm542_vm4, %v751_v2  ;;  %v1522_v2 = vld [vmem:[%s2030_s6 + $0x50] sm:$0xff] }
 0x1c5   : > { %1031 = vmatpush.bf16.msra.mxu2 %v1522_v2 }
 0x233   : > { %v684_v6 = vpop.f32.mrf.mxu0 }
 0x235   : > { %v736_v9 = vpop.f32.mrf.mxu1 }
 0x237   : > { %v605_v3 = vpop.f32.mrf.mxu2 }
 0x238   : > { %v640_v4 = vpop.f32.mrf.mxu3 }
 0x239   : > { %v641_v5 = vadd.f32 %v640_v4, %v605_v3  ;;  %v1515_v3 = vld [vmem:[%s2030_s6 + $0x18] sm:$0xff]  ;;  %v1512_v4 = vld [vmem:[%s2030_s6] sm:$0xff] }
 0x23a   : > { %905 = vmatpush.bf16.msrb.mxu3 %v1515_v3  ;;  %940 = vmatpush.bf16.msra.mxu0 %v1512_v4 }
 0x23b   : > { %v689_v8 = vadd.f32 %v684_v6, %v641_v5  ;;  %v686_v16 = vpop.f32.mrf.mxu0  ;;  %v1518_v5 = vld [vmem:[%s2030_s6 + $0x30] sm:$0xff]  ;;  %v1521_v6 = vld [vmem:[%s2030_s6 + $0x48] sm:$0xff] }
 0x23c   : > { %984 = vmatpush.bf16.msra.mxu1 %v1518_v5  ;;  %1032 = vmatpush.bf16.msra.mxu2 %v1521_v6 }
 0x23d   : > { %v741_v12 = vadd.f32 %v736_v9, %v689_v8  ;;  %v738_v21 = vpop.f32.mrf.mxu1  ;;  %v1531_v8 = vld [vmem:[%s2034_s10 + $0x8] sm:$0xff] }
 0x23e   : > { %v1525_v9 = vld [vmem:[%s2030_s6 + $0x68] sm:$0xff] }
 0x23f   : > { %v607_v7 = vpop.f32.mrf.mxu2 }
 0x240   : > { %v642_v10 = vpop.f32.mrf.mxu3  ;;  %1215 = vmatpush.bf16.msrb.mxu1 %v1531_v8 }
 0x241   : > { %v643_v11 = vadd.f32 %v642_v10, %v607_v7  ;;  %v1526_v7 = vld [vmem:[%s2030_s6 + $0x70] sm:$0xff]  ;;  %v1530_v10 = vld [vmem:[%s2034_s10] sm:$0xff] }
 0x242   : > { %1078 = vmatpush.bf16.msra.mxu3 %v1526_v7 }
 0x243   : > { %v690_v18 = vadd.f32 %v686_v16, %v643_v11 }
 0x244   : > { %1216 = vmatpush.bf16.msrb.mxu1 %v1530_v10 }
 0x245   : > { %v742_v22 = vadd.f32 %v738_v21, %v690_v18 }
 0x246   : > { %1079 = vmatpush.bf16.msra.mxu3 %v1525_v9 }
 0x247   : > { %v788_v14 = vpop.f32.mrf.mxu2 }
 0x248   : > { %v793_v15 = vadd.f32 %v788_v14, %v741_v12  ;;  %v1524_v12 = vld [vmem:[%s2030_s6 + $0x60] sm:$0xff] }
 0x24a   : > { %v1884_v19 = vadd.f32 %v1579_v13, %v793_v15  ;;  %1080 = vmatpush.bf16.msra.mxu3 %v1524_v12 }
 0x24c   : > { %v1397_v20 = vmul.f32 -1.442695, %v1884_v19 }
 0x24e   : > { %1582 = vpow2.f32 %v1397_v20 }
 0x24f   : > { %v790_v23 = vpop.f32.mrf.mxu2 }
 0x250   : > { %v794_v24 = vadd.f32 %v790_v23, %v742_v22 }
 0x252   : > { %v1887_v25 = vadd.f32 %v1579_v13, %v794_v24 }
 0x254   : > { %v1583_v26 = vpop.eup %1582  ;;  %v1398_v27 = vmul.f32 -1.442695, %v1887_v25 }
 0x255   : > { %v807_v28 = vadd.f32 1.0, %v1583_v26 }
 0x256   : > { %1584 = vpow2.f32 %v1398_v27 }
 0x257   : > { %1586 = vrcp.f32 %v807_v28  ;;  %v820_v34 = vand.u32 2147483648, %v807_v28  ;;  %v818_v38 = vand.u32 2147483647, %v807_v28  ;;  %vm814_vm10 = vweird.f32 %v807_v28 }
 0x259   : > { %v821_v42 = vor.u32 1.1754944e-38, %v820_v34  ;;  %vm819_vm12 = vcmp.eq.f32.partialorder %v818_v38, 8.507059e+37 }
 0x25c   : > { %v1585_v29 = vpop.eup %1584 }
 0x25d   : > { %v1587_v30 = vpop.eup %1586  ;;  %v808_v31 = vadd.f32 1.0, %v1585_v29 }
 0x25e   : > { %v810_v32 = vmul.f32 %v1587_v30, %v807_v28  ;;  %vm815_vm9 = vweird.f32 %v1587_v30 }
 0x25f   : > { %1588 = vrcp.f32 %v808_v31  ;;  %vm816_vm11 = vmor %vm814_vm10, %vm815_vm9  ;;  %v835_v51 = vand.u32 2147483648, %v808_v31  ;;  %v833_v53 = vand.u32 2147483647, %v808_v31  ;;  %vm829_vm14 = vweird.f32 %v808_v31 }
 0x260   : > { %v811_v33 = vsub.f32 1.0, %v810_v32 }
 0x261   : > { %v836_v55 = vor.u32 1.1754944e-38, %v835_v51  ;;  %vm834_vm0 = vcmp.eq.f32.partialorder %v833_v53, 8.507059e+37 }
 0x262   : > { %v812_v37 = vmul.f32 %v1587_v30, %v811_v33 }
 0x264   : > { %v813_v39 = vadd.f32 %v1587_v30, %v812_v37 }
 0x265   : > { %v1589_v41 = vpop.eup %1588 }
 0x266   : > { %v817_v47 = vsel %vm816_vm11, %v1587_v30, %v813_v39  ;;  %v825_v48 = vmul.f32 %v1589_v41, %v808_v31  ;;  %vm830_vm13 = vweird.f32 %v1589_v41 }
 0x267   : > { %v822_v49 = vsel %vm819_vm12, %v821_v42, %v817_v47  ;;  %vm831_vm15 = vmor %vm829_vm14, %vm830_vm13 }
 0x268   : > { %841 = vrot.lane.b32.xlu1 %v822_v49, %s2036_s22  ;;  %v826_v50 = vsub.f32 1.0, %v825_v48 }
 0x26a   : > { %v827_v52 = vmul.f32 %v1589_v41, %v826_v50 }
 0x26c   : > { %v828_v54 = vadd.f32 %v1589_v41, %v827_v52 }
 0x26e   : > { %v832_v56 = vsel %vm831_vm15, %v1589_v41, %v828_v54 }
 0x26f   : > { %v837_v57 = vsel %vm834_vm0, %v836_v55, %v832_v56 }
 0x270   : > { %843 = vrot.lane.b32.xlu1 %v837_v57, %s2036_s22 }
 0x2da   : > { %v842_v11 = vpop.permute.xlu1 %841 }
 0x2db   : > { %v847_v13 = vmul.f32 %v842_v11, %v1884_v19 }
 0x2dd   : > { %v849_v14 = vadd.f32 %v847_v13, %v478_v36 }
 0x2df   : > { %v1946_v15 = vmul.f32 0.70710677, %v849_v14 }
 0x2e1   : > { %853 = vst.msk [vmem:[#allocation2 + $0x2] sm:$0xff] %vm542_vm4, %v1946_v15 }
 0x2e2   : > { %v844_v16 = vpop.permute.xlu1 %843 }
 0x2e3   : > { %v848_v18 = vmul.f32 %v844_v16, %v1887_v25 }
 0x2e5   : > { %v850_v20 = vadd.f32 %v848_v18, %v479_v43 }
 0x2e7   : > { %v1953_v21 = vmul.f32 0.70710677, %v850_v20 }
 0x2e8   : > { %v866_v19 = vld [vmem:[#allocation2 + $0x1] sm:$0xff] }
 0x2e9   : > { %854 = vst.msk [vmem:[#allocation2 + $0xa] sm:$0xff] %vm542_vm4, %v1953_v21  ;;  %v855_v35 = vld [vmem:[#allocation2] sm:$0xff]  ;;  %v868_v23 = vsel %vm517_vm5, %v866_v19, 0.0 }
 0x2ea   : > { %v947_v36 = vld [vmem:[#allocation2 + $0x2] sm:$0xff]  ;;  %v857_v26 = vsel %vm509_vm6, %v855_v35, 0.0 }
 0x2f0   : > { %v867_v22 = vld [vmem:[#allocation2 + $0x9] sm:$0xff] }
 0x2f1   : > { %v856_v24 = vld [vmem:[#allocation2 + $0x8] sm:$0xff]  ;;  %v870_v27 = vpack.c.bf16 %v867_v22, %v868_v23  ;;  %v1529_v23 = vld [vmem:[%s2032_s8 + $0x10] sm:$0xff] }
 0x2f2   : > { %v948_v25 = vld [vmem:[#allocation2 + $0xa] sm:$0xff]  ;;  %v859_v40 = vpack.c.bf16 %v856_v24, %v857_v26  ;;  %1184 = vmatpush.bf16.msrb.mxu0 %v1529_v23  ;;  %v1527_v26 = vld [vmem:[%s2032_s8] sm:$0xff] }
 0x2f3   : > { %v949_v43 = vpack.c.bf16 %v948_v25, %v947_v36  ;;  %v993_v28 = vld [vmem:[#allocation2 + $0x3] sm:$0xff]  ;;  %v994_v29 = vld [vmem:[#allocation2 + $0xb] sm:$0xff]  ;;  %1411 = vmatmul.msk.bf16.vlgmr.msrb.gmra.mxu3 %vm542_vm4, %v870_v27 }
 0x2f4   : > { %v996_v30 = vsel %vm528_vm7, %v994_v29, 0.0  ;;  %1424 = vmatmul.msk.bf16.vlgmr.msra.gmra.mxu0 %vm542_vm4, %v859_v40  ;;  %v1042_v44 = vld [vmem:[#allocation2 + $0xc] sm:$0xff]  ;;  %v1041_v45 = vld [vmem:[#allocation2 + $0x4] sm:$0xff] }
 0x2f5   : > { %v997_v31 = vpack.c.bf16 %v996_v30, %v993_v28  ;;  %1437 = vmatmul.msk.bf16.vlgmr.msra.gmra.mxu1 %vm542_vm4, %v949_v43  ;;  %v1044_v32 = vsel %vm536_vm8, %v1042_v44, 0.0  ;;  %v1528_v24 = vld [vmem:[%s2032_s8 + $0x8] sm:$0xff] }
 0x2f6   : > { %v1045_v33 = vpack.c.bf16 %v1044_v32, %v1041_v45  ;;  %1185 = vmatpush.bf16.msrb.mxu0 %v1528_v24  ;;  %v1581_v45 = vld [vmem:[%s2033_s9] ss:$0 sm:$0xff] }
 0x2f7   : > { %1450 = vmatmul.msk.bf16.vlgmr.msra.gmra.mxu2 %vm542_vm4, %v997_v31 }
 0x2fa   : > { %1186 = vmatpush.bf16.msrb.mxu0 %v1527_v26 }
 0x303   : > { %1463 = vmatmul.msk.bf16.vlgmr.msra.gmra.mxu3 %vm542_vm4, %v1045_v33 }
 0x305   : > { %1487 = vmatmul.msk.bf16.vlgmr.msrb.gmra.mxu1 %vm422_vm3, %v1792_v17 }
 0x371   : > { %v942_v34 = vpop.f32.mrf.mxu0 }
 0x372   : > { %v986_v38 = vpop.f32.mrf.mxu1 }
 0x376   : > { %v907_v46 = vpop.f32.mrf.mxu3 }
 0x377   : > { %v943_v37 = vadd.f32 %v942_v34, %v907_v46 }
 0x379   : > { %v991_v41 = vadd.f32 %v986_v38, %v943_v37  ;;  %v944_v47 = vpop.f32.mrf.mxu0 }
 0x37a   : > { %v1034_v42 = vpop.f32.mrf.mxu2  ;;  %v988_v52 = vpop.f32.mrf.mxu1 }
 0x37b   : > { %v1039_v48 = vadd.f32 %v1034_v42, %v991_v41 }
 0x37e   : > { %v909_v39 = vpop.f32.mrf.mxu3 }
 0x37f   : > { %v945_v49 = vadd.f32 %v944_v47, %v909_v39 }
 0x381   : > { %v992_v53 = vadd.f32 %v988_v52, %v945_v49 }
 0x382   : > { %v1036_v55 = vpop.f32.mrf.mxu2  ;;  %v1218_v32 = vpop.f32.mrf.mxu1 }
 0x383   : > { %v1040_v56 = vadd.f32 %v1036_v55, %v992_v53 }
 0x386   : > { %v1082_v50 = vpop.f32.mrf.mxu3 }
 0x387   : > { %v1087_v51 = vadd.f32 %v1082_v50, %v1039_v48 }
 0x389   : > { %v1093_v54 = vadd.f32 %v1580_v62, %v1087_v51 }
 0x38a   : > { %v1220_v37 = vpop.f32.mrf.mxu1 }
 0x38b   : > { %v1464_v17 = vmul.f32 -1.442695, %v1093_v54 }
 0x38d   : > { %1590 = vpow2.f32 %v1464_v17 }
 0x38e   : > { %v1084_v57 = vpop.f32.mrf.mxu3 }
 0x38f   : > { %v1088_v58 = vadd.f32 %v1084_v57, %v1040_v56 }
 0x391   : > { %v1094_v59 = vadd.f32 %v1580_v62, %v1088_v58 }
 0x393   : > { %v1591_v60 = vpop.eup %1590  ;;  %v1465_v61 = vmul.f32 -1.442695, %v1094_v59 }
 0x394   : > { %v1101_v63 = vadd.f32 1.0, %v1591_v60 }
 0x395   : > { %1592 = vpow2.f32 %v1465_v61 }
 0x396   : > { %1594 = vrcp.f32 %v1101_v63  ;;  %v1114_v5 = vand.u32 2147483648, %v1101_v63  ;;  %v1112_v7 = vand.u32 2147483647, %v1101_v63  ;;  %vm1108_vm2 = vweird.f32 %v1101_v63 }
 0x398   : > { %v1115_v10 = vor.u32 1.1754944e-38, %v1114_v5  ;;  %vm1113_vm5 = vcmp.eq.f32.partialorder %v1112_v7, 8.507059e+37 }
 0x39b   : > { %v1593_v0 = vpop.eup %1592 }
 0x39c   : > { %v1595_v1 = vpop.eup %1594  ;;  %v1102_v2 = vadd.f32 1.0, %v1593_v0 }
 0x39d   : > { %v1104_v3 = vmul.f32 %v1595_v1, %v1101_v63  ;;  %vm1109_vm1 = vweird.f32 %v1595_v1 }
 0x39e   : > { %1596 = vrcp.f32 %v1102_v2  ;;  %vm1110_vm3 = vmor %vm1108_vm2, %vm1109_vm1  ;;  %v1129_v16 = vand.u32 2147483648, %v1102_v2  ;;  %v1127_v20 = vand.u32 2147483647, %v1102_v2  ;;  %vm1123_vm7 = vweird.f32 %v1102_v2 }
 0x39f   : > { %v1105_v4 = vsub.f32 1.0, %v1104_v3 }
 0x3a0   : > { %v1130_v35 = vor.u32 1.1754944e-38, %v1129_v16  ;;  %vm1128_vm9 = vcmp.eq.f32.partialorder %v1127_v20, 8.507059e+37 }
 0x3a1   : > { %v1106_v6 = vmul.f32 %v1595_v1, %v1105_v4 }
 0x3a3   : > { %v1107_v8 = vadd.f32 %v1595_v1, %v1106_v6 }
 0x3a4   : > { %v1597_v9 = vpop.eup %1596 }
 0x3a5   : > { %v1111_v11 = vsel %vm1110_vm3, %v1595_v1, %v1107_v8  ;;  %v1119_v12 = vmul.f32 %v1597_v9, %v1102_v2  ;;  %vm1124_vm6 = vweird.f32 %v1597_v9 }
 0x3a6   : > { %v1116_v13 = vsel %vm1113_vm5, %v1115_v10, %v1111_v11  ;;  %vm1125_vm8 = vmor %vm1123_vm7, %vm1124_vm6 }
 0x3a7   : > { %1135 = vrot.lane.b32.xlu2 %v1116_v13, %s2042_s14  ;;  %v1120_v14 = vsub.f32 1.0, %v1119_v12 }
 0x3a9   : > { %v1121_v18 = vmul.f32 %v1597_v9, %v1120_v14 }
 0x3ab   : > { %v1122_v19 = vadd.f32 %v1597_v9, %v1121_v18 }
 0x3ad   : > { %v1126_v36 = vsel %vm1125_vm8, %v1597_v9, %v1122_v19 }
 0x3ae   : > { %v1131_v22 = vsel %vm1128_vm9, %v1130_v35, %v1126_v36 }
 0x3af   : > { %1137 = vrot.lane.b32.xlu2 %v1131_v22, %s2042_s14  ;;  %s1309_s14 = sshll.u32 %s378_s30, 4 }
 0x3b0   : > { %s380_s22 = scalar_lea.vmem [#allocation3], %s1309_s14 }
 0x3b1   : > { %s1240_s29 = sshll.u32 %s380_s22, 4  ;;  %s1241_s29 = int_to_ptr.vmem [resolvable:$true] %s1240_s29 }
 0x401   : > { %v1136_v25 = vpop.permute.xlu2 %1135 }
 0x402   : > { %v1141_v27 = vmul.f32 %v1136_v25, %v1093_v54 }
 0x404   : > { %v1143_v43 = vadd.f32 %v1141_v27, %v1946_v15 }
 0x406   : > { %v1145_v30 = vmul.f32 0.70710677, %v1143_v43 }
 0x409   : > { %v1138_v40 = vpop.permute.xlu2 %1137 }
 0x40a   : > { %v1142_v28 = vmul.f32 %v1138_v40, %v1094_v59 }
 0x40c   : > { %v1144_v29 = vadd.f32 %v1142_v28, %v1953_v21 }
 0x40e   : > { %v1146_v31 = vmul.f32 0.70710677, %v1144_v29 }
 0x410   : > { %v1147_v44 = vpack.c.bf16 %v1146_v31, %v1145_v30 }
 0x412   : > { %1478 = vmatmul.msk.bf16.vlgmr.msrb.gmra.mxu0 %vm542_vm4, %v1147_v44 }
 0x48f   : > { %v1188_v33 = vpop.f32.mrf.mxu0 }
 0x490   : > { %v1189_v46 = vadd.f32 %v1581_v45, %v1188_v33 }
 0x492   : > { %v1223_v34 = vadd.f32 %v1218_v32, %v1189_v46 }
 0x494   : > { %1225 = vst [vmem:[%s380_s22] sm:$0xff] %v1223_v34 }
 0x497   : > { %v1190_v15 = vpop.f32.mrf.mxu0 }
 0x498   : > { %v1191_v21 = vadd.f32 %v1581_v45, %v1190_v15 }
 0x49a   : > { %v1224_v38 = vadd.f32 %v1220_v37, %v1191_v21 }
 0x49c   : > { %1226 = vst [vmem:[%s380_s22 + $0x8] sm:$0xff] %v1224_v38 }
 0x49d   : > { %1625 = shalt.err (!%p1622_p3)
}
 0x49e   : > { %s1665_s30 = smov 128   ;;  %s1666_s22 = smov 8  }
 0x49f   : > { %1533 = dma.vmem_to_hbm [thread:$0]  (%p1765_p5), %s1241_s29, 256, %s1243_s0, %s1228_s12, %s1665_s30, %s1665_s30, %s1666_s22  }
 0x4a0 PF: > { %p1539_p4 = scmp.ge.s32.totalorder %s1660_s20, 2  ;;  %s1257_s14 = sand.u32 1, %s1648_s17  }
 0x4a1   : > { %s1258_s16 = scalar_lea.sflag [#allocation4], %s1257_s14 }
 0x4a2   : > { %p1536_p7 = pnand %p1539_p4, %p1769_p6 }
 0x4a4   : > { %p1537_p8 = pneg %p1536_p7 }
 0x4a6   : > { %1643 = dma.done.wait (%p1537_p8), %s1258_s16, 256  }
 0x4a7   : > { %1645 = vsyncadd (%p1537_p8), %s1258_s16, 4294967040  ;;  %p21_p9 = scmp.ge.s32.totalorder %s1752_s23, 4   ;;  %s2043_s17 = smov %s1652_s18 }
 0x4a8   : > { %s2044_s18 = smov %s1656_s19  ;;  %s2045_s19 = smov %s1763_s26 }
 0x4a9   : > { %s2046_s20 = smov %s1752_s23  ;;  %23 = sbr.rel (!%p21_p9) target bundleno = 5 (0x5), region = 99 }
 0x4ae   :  { %1264 = vsyncpa [#allocation4], 1 }
 0x4af   :  { %1266 = vsyncpa [#allocation4 + $0x1], 1 }

</bundles_post_ra>
